<compile_context>
chip_gen: v7x
topology: tpu7x:2x2x1
jax: 0.10.0
libtpu: 0.0.40
codegen_flags: <defaults>
</compile_context>

<pallas_src>
import functools

import jax
import jax.numpy as jnp
from jax.experimental import pallas as pl
from jax.experimental.pallas import tpu as pltpu


def _round_up(x, m):
    return (x + m - 1) // m * m


def _pick_tile(n_pad, want):
    """Largest multiple of 128 that divides n_pad and is <= want (n_pad % 128 == 0)."""
    t = min(want, n_pad)
    t -= t % 128
    t = max(t, 128)
    while t > 128 and n_pad % t != 0:
        t -= 128
    return t


def plan_padding(n, tile=512):
    """Padded node count: multiple of `tile` for big graphs, of 128 otherwise."""
    if n >= tile:
        return _round_up(n, tile)
    return _round_up(n, 128)


# ----------------------------------------------------------------------------------
# Kernels: one (row-tile, k-tile) step of  out = A_hat @ z, with z resident in VMEM.
# ----------------------------------------------------------------------------------

def prop_acc_kernel(a_ref, z_ref, h_ref, acc_ref, *, tile_k):
    """Stage 1: bf16 output, f32 scratch accumulator (kept for precision)."""
    k = pl.program_id(1)

    @pl.when(k == 0)
    def _():
        acc_ref[...] = jnp.zeros_like(acc_ref)

    start = pl.multiple_of(k * tile_k, tile_k)
    acc_ref[...] += jnp.dot(
        a_ref[...], z_ref[pl.ds(start, tile_k), :], preferred_element_type=jnp.float32
    )

    @pl.when(k == pl.num_programs(1) - 1)
    def _():
        h_ref[...] = acc_ref[...].astype(h_ref.dtype)


def prop_out_kernel(a_ref, z_ref, o_ref, *, tile_k):
    """Stage 2: f32 output block is resident across the k axis -> accumulate in place."""
    k = pl.program_id(1)

    @pl.when(k == 0)
    def _():
        o_ref[...] = jnp.zeros_like(o_ref)

    start = pl.multiple_of(k * tile_k, tile_k)
    o_ref[...] += jnp.dot(
        a_ref[...], z_ref[pl.ds(start, tile_k), :], preferred_element_type=jnp.float32
    )


# ----------------------------------------------------------------------------------
# Plain-JAX glue: normalized dense adjacency (built once per graph, padded, bf16).
# ----------------------------------------------------------------------------------

def build_normalized_adjacency(edge_index, num_nodes, n_pad, dtype=jnp.bfloat16):
    """gcn_norm (add self-loops, symmetric D^-1/2 norm) + to_dense_adj, padded to n_pad.

    Static per graph: build once and reuse across forward calls.
    """
    # TODO(synk): for very large graphs (N >~ 45-60k on v5e) a scalar-prefetch sparse
    # formulation is needed instead of the dense O(N^2) adjacency.
    src, dst = edge_index[0], edge_index[1]
    loop = jnp.arange(num_nodes, dtype=src.dtype)
    src = jnp.concatenate([src, loop])
    dst = jnp.concatenate([dst, loop])
    ew = jnp.ones(src.shape[0], dtype=jnp.float32)
    deg = jnp.zeros((num_nodes,), dtype=jnp.float32).at[dst].add(ew)
    dinv = jnp.where(deg > 0, jax.lax.rsqrt(deg), jnp.zeros_like(deg))
    norm = dinv[src] * ew * dinv[dst]
    # message flows source -> target: out[target] += norm * x[source]
    adj = jnp.zeros((n_pad, n_pad), dtype=jnp.float32).at[dst, src].add(norm)
    return adj.astype(dtype)


# ----------------------------------------------------------------------------------
# Forward: out = A_hat @ (A_hat @ (x @ W))
# ----------------------------------------------------------------------------------

def simple_gcn_forward(x, adj_p, weight, *, tile=512):
    """x: [N, F], adj_p: [n_pad, n_pad] bf16 (from build_normalized_adjacency),
    weight: [F, C] (= torch lin.weight.T).
    """
    n, f = x.shape
    c = weight.shape[1]
    n_pad = adj_p.shape[0]
    c_pad = _round_up(c, 128)  # lane-dense output blocks -> unmasked stores

    tile_m = tile_k = _pick_tile(n_pad, tile)
    # v7x megacore: keep >= 2 row tiles so the "parallel" axis splits across both TCs
    # (only worth shrinking tile_m once the graph is big enough).
    if n_pad >= 512 and n_pad // tile_m < 2:
        tile_m = _pick_tile(n_pad, n_pad // 2)

    # Projection hoisted out of the propagation loops: one tiny [N,F]@[F,C] matmul.
    x_p = jnp.pad(x, ((0, n_pad - n), (0, 0))).astype(jnp.bfloat16)
    w_p = jnp.pad(weight, ((0, 0), (0, c_pad - c))).astype(jnp.bfloat16)
    z = jnp.dot(x_p, w_p, preferred_element_type=jnp.float32).astype(jnp.bfloat16)

    grid = (n_pad // tile_m, n_pad // tile_k)

    # VMEM budget: double-buffered adj tiles + resident z/h (assume 2 buffers each,
    # conservatively) + output block + scratch. Raise the scoped limit only if needed.
    vmem_bytes = (
        2 * tile_m * tile_k * 2          # adjacency tiles, bf16, double-buffered
        + 2 * n_pad * c_pad * 2          # resident z / h, bf16
        + tile_m * c_pad * 4             # output block (f32)
        + tile_m * c_pad * 4             # stage-1 scratch accumulator (f32)
    )
    vmem_limit = None
    if vmem_bytes > 14 * 1024 * 1024:
        vmem_limit = min(_round_up(vmem_bytes, 1 << 20) + (4 << 20), 56 * 1024 * 1024)

    cparams = pltpu.CompilerParams(
        dimension_semantics=("parallel", "arbitrary"),
        vmem_limit_bytes=vmem_limit,
    )

    a_spec = pl.BlockSpec((tile_m, tile_k), lambda i, k: (i, k))
    z_spec = pl.BlockSpec((n_pad, c_pad), lambda i, k: (0, 0))   # fully VMEM-resident
    out_spec = pl.BlockSpec((tile_m, c_pad), lambda i, k: (i, 0))

    flops = 2 * n_pad * n_pad * c_pad
    adj_bytes = n_pad * n_pad * 2

    # --- stage 1: h = A_hat @ z ---------------------------------------------------
    h = pl.pallas_call(
        functools.partial(prop_acc_kernel, tile_k=tile_k),
        out_shape=jax.ShapeDtypeStruct((n_pad, c_pad), jnp.bfloat16),
        grid=grid,
        in_specs=[a_spec, z_spec],
        out_specs=out_spec,
        scratch_shapes=[pltpu.VMEM((tile_m, c_pad), jnp.float32)],
        compiler_params=cparams,
        cost_estimate=pl.CostEstimate(
            flops=flops,
            transcendentals=0,
            bytes_accessed=adj_bytes + 2 * n_pad * c_pad * 2,
        ),
    )(adj_p, z)

    # --- stage 2: out = A_hat @ h  (accumulate straight into the f32 output) -------
    out = pl.pallas_call(
        functools.partial(prop_out_kernel, tile_k=tile_k),
        out_shape=jax.ShapeDtypeStruct((n_pad, c_pad), jnp.float32),
        grid=grid,
        in_specs=[a_spec, z_spec],
        out_specs=out_spec,
        compiler_params=cparams,
        cost_estimate=pl.CostEstimate(
            flops=flops,
            transcendentals=0,
            bytes_accessed=adj_bytes + n_pad * c_pad * 2 + n_pad * c_pad * 4,
        ),
    )(adj_p, h)

    return out[:n, :c]


def reference_forward(x, edge_index, weight):
    n = x.shape[0]
    adj = build_normalized_adjacency(edge_index, n, n, dtype=jnp.float32)
    return (adj @ (adj @ x)) @ weight


if __name__ == "__main__":
    key = jax.random.PRNGKey(0)
    k_x, k_w = jax.random.split(key)

    N = 200         # num nodes (pads to 256 -> exercises padding + lane-dense blocks)
    F = 16          # args.num_feats
    C = 8           # args.num_classes

    # Deterministic node features.
    x = jax.random.normal(k_x, (N, F), dtype=jnp.float32)

    # Deterministic linear weight (torch nn.Linear(F, C, bias=False) -> weight [C, F]);
    # stored transposed as [F, C] so the kernel does h @ w.
    w = (jax.random.uniform(k_w, (F, C), dtype=jnp.float32) - 0.5) * (2.0 / jnp.sqrt(F))

    # Deterministic bidirectional ring graph plus a few chords.
    idx = jnp.arange(N, dtype=jnp.int32)
    ring_src = jnp.concatenate([idx, (idx + 1) % N])
    ring_dst = jnp.concatenate([(idx + 1) % N, idx])
    chord_src = jnp.concatenate([idx, (idx + 5) % N])
    chord_dst = jnp.concatenate([(idx + 5) % N, idx])
    edge_index = jnp.stack(
        [jnp.concatenate([ring_src, chord_src]), jnp.concatenate([ring_dst, chord_dst])]
    )

    # Padded bf16 adjacency: static per graph, built once and cached outside the
    # per-forward path (the kernels are the critical path for repeated calls).
    n_pad = plan_padding(N, tile=512)
    adj_p = build_normalized_adjacency(edge_index, N, n_pad, dtype=jnp.bfloat16)
    adj_p = jax.block_until_ready(adj_p)

    fwd = jax.jit(simple_gcn_forward, static_argnames=("tile",))
    out = fwd(x, adj_p, w)
    out = jax.block_until_ready(out)

    ref = reference_forward(x, edge_index, w)
    assert out.shape == (N, C)
    # Tolerance accounts for bf16 adjacency / z / h (values are O(1), so 2e-2 still
    # comfortably detects real bugs).
    assert jnp.allclose(out, ref, atol=2e-2, rtol=2e-2), "mismatch vs. reference"

    print("KERNEL_OK")
</pallas_src>

<mosaic_0001>
module attributes {stable_mosaic.version = 11 : i64} {
  func.func @prop_acc_kernel(%arg0: i32, %arg1: i32, %arg2: memref<256x256xbf16, #tpu.memory_space<vmem>>, %arg3: memref<256x128xbf16, #tpu.memory_space<vmem>>, %arg4: memref<256x128xbf16, #tpu.memory_space<vmem>>, %arg5: memref<256x128xf32, #tpu.memory_space<vmem>>) attributes {dimension_semantics = [#tpu.dimension_semantics<parallel>, #tpu.dimension_semantics<arbitrary>], iteration_bounds = array<i64: 1, 1>, scalar_prefetch = 0 : i64, scratch_operands = 1 : i64, tpu.core_type = #tpu.core_type<tc>, window_params = [{transform_indices = @transform_0, window_bounds = array<i64: 256, 256>}, {pipeline_mode = #tpu.pipeline_mode<synchronous>, transform_indices = @transform_1, window_bounds = array<i64: 256, 128>}, {transform_indices = @transform_2, window_bounds = array<i64: 256, 128>}]} {
    %c0_i32 = arith.constant 0 : i32
    %0 = arith.cmpi eq, %arg1, %c0_i32 : i32
    %1 = arith.extui %0 : i1 to i32
    %c0_i32_0 = arith.constant 0 : i32
    %2 = arith.cmpi ne, %1, %c0_i32_0 : i32
    scf.if %2 {
      %cst_9 = arith.constant 0.000000e+00 : f32
      %15 = vector.broadcast %cst_9 : f32 to vector<256x128xf32>
      %c0_10 = arith.constant 0 : index
      %c0_11 = arith.constant 0 : index
      %16 = vector.load %arg5[%c0_10, %c0_11] : memref<256x128xf32, #tpu.memory_space<vmem>>, vector<256x128xf32>
      tpu.vector_store %arg5[%c0_10, %c0_11], %15 {strides = array<i32>} : memref<256x128xf32, #tpu.memory_space<vmem>>, vector<256x128xf32>,
    } else {
    }
    %c256_i32 = arith.constant 256 : i32
    %3 = arith.muli %arg1, %c256_i32 : i32
    %4 = tpu.assume_multiple %3, 256 : i32
    %c0 = arith.constant 0 : index
    %c0_1 = arith.constant 0 : index
    %5 = vector.load %arg5[%c0, %c0_1] : memref<256x128xf32, #tpu.memory_space<vmem>>, vector<256x128xf32>
    %c0_2 = arith.constant 0 : index
    %c0_3 = arith.constant 0 : index
    %6 = vector.load %arg2[%c0_2, %c0_3] : memref<256x256xbf16, #tpu.memory_space<vmem>>, vector<256x256xbf16>
    %7 = arith.index_cast %4 : i32 to index
    %c0_4 = arith.constant 0 : index
    %8 = vector.load %arg3[%7, %c0_4] : memref<256x128xbf16, #tpu.memory_space<vmem>>, vector<256x128xbf16>
    %cst = arith.constant dense<0.000000e+00> : vector<256x128xf32>
    %9 = tpu.matmul %6, %8, %cst {dimension_numbers = #tpu.dot_dimension_numbers<[1], [0], [0], [1], [0, 0, 1, 1], [], []>} : vector<256x256xbf16>, vector<256x128xbf16>, vector<256x128xf32> -> vector<256x128xf32>
    %10 = arith.addf %5, %9 : vector<256x128xf32>
    %c0_5 = arith.constant 0 : index
    %c0_6 = arith.constant 0 : index
    %11 = vector.load %arg5[%c0_5, %c0_6] : memref<256x128xf32, #tpu.memory_space<vmem>>, vector<256x128xf32>
    tpu.vector_store %arg5[%c0_5, %c0_6], %10 {strides = array<i32>} : memref<256x128xf32, #tpu.memory_space<vmem>>, vector<256x128xf32>,
    %c0_i32_7 = arith.constant 0 : i32
    %12 = arith.cmpi eq, %arg1, %c0_i32_7 : i32
    %13 = arith.extui %12 : i1 to i32
    %c0_i32_8 = arith.constant 0 : i32
    %14 = arith.cmpi ne, %13, %c0_i32_8 : i32
    scf.if %14 {
      %c0_9 = arith.constant 0 : index
      %c0_10 = arith.constant 0 : index
      %15 = vector.load %arg5[%c0_9, %c0_10] : memref<256x128xf32, #tpu.memory_space<vmem>>, vector<256x128xf32>
      %16 = arith.truncf %15 : vector<256x128xf32> to vector<256x128xbf16>
      %c0_11 = arith.constant 0 : index
      %c0_12 = arith.constant 0 : index
      %17 = vector.load %arg4[%c0_11, %c0_12] : memref<256x128xbf16, #tpu.memory_space<vmem>>, vector<256x128xbf16>
      tpu.vector_store %arg4[%c0_11, %c0_12], %16 {strides = array<i32>} : memref<256x128xbf16, #tpu.memory_space<vmem>>, vector<256x128xbf16>,
    } else {
    }
    return
  }
  func.func @transform_0(%arg0: i32, %arg1: i32) -> (i32, i32) {
    %c0_i32 = arith.constant 0 : i32
    return %arg0, %arg1 : i32, i32
  }
  func.func @transform_1(%arg0: i32, %arg1: i32) -> (i32, i32) {
    %c0_i32 = arith.constant 0 : i32
    %c0_i32_0 = arith.constant 0 : i32
    %c0_i32_1 = arith.constant 0 : i32
    return %c0_i32, %c0_i32_0 : i32, i32
  }
  func.func @transform_2(%arg0: i32, %arg1: i32) -> (i32, i32) {
    %c0_i32 = arith.constant 0 : i32
    %c0_i32_0 = arith.constant 0 : i32
    return %arg0, %c0_i32 : i32, i32
  }
}

module attributes {stable_mosaic.version = 11 : i64} {
  func.func @prop_out_kernel(%arg0: i32, %arg1: i32, %arg2: memref<256x256xbf16, #tpu.memory_space<vmem>>, %arg3: memref<256x128xbf16, #tpu.memory_space<vmem>>, %arg4: memref<256x128xf32, #tpu.memory_space<vmem>>) attributes {dimension_semantics = [#tpu.dimension_semantics<parallel>, #tpu.dimension_semantics<arbitrary>], iteration_bounds = array<i64: 1, 1>, scalar_prefetch = 0 : i64, scratch_operands = 0 : i64, tpu.core_type = #tpu.core_type<tc>, window_params = [{transform_indices = @transform_0, window_bounds = array<i64: 256, 256>}, {pipeline_mode = #tpu.pipeline_mode<synchronous>, transform_indices = @transform_1, window_bounds = array<i64: 256, 128>}, {transform_indices = @transform_2, window_bounds = array<i64: 256, 128>}]} {
    %c0_i32 = arith.constant 0 : i32
    %0 = arith.cmpi eq, %arg1, %c0_i32 : i32
    %1 = arith.extui %0 : i1 to i32
    %c0_i32_0 = arith.constant 0 : i32
    %2 = arith.cmpi ne, %1, %c0_i32_0 : i32
    scf.if %2 {
      %cst_7 = arith.constant 0.000000e+00 : f32
      %12 = vector.broadcast %cst_7 : f32 to vector<256x128xf32>
      %c0_8 = arith.constant 0 : index
      %c0_9 = arith.constant 0 : index
      %13 = vector.load %arg4[%c0_8, %c0_9] : memref<256x128xf32, #tpu.memory_space<vmem>>, vector<256x128xf32>
      tpu.vector_store %arg4[%c0_8, %c0_9], %12 {strides = array<i32>} : memref<256x128xf32, #tpu.memory_space<vmem>>, vector<256x128xf32>,
    } else {
    }
    %c256_i32 = arith.constant 256 : i32
    %3 = arith.muli %arg1, %c256_i32 : i32
    %4 = tpu.assume_multiple %3, 256 : i32
    %c0 = arith.constant 0 : index
    %c0_1 = arith.constant 0 : index
    %5 = vector.load %arg4[%c0, %c0_1] : memref<256x128xf32, #tpu.memory_space<vmem>>, vector<256x128xf32>
    %c0_2 = arith.constant 0 : index
    %c0_3 = arith.constant 0 : index
    %6 = vector.load %arg2[%c0_2, %c0_3] : memref<256x256xbf16, #tpu.memory_space<vmem>>, vector<256x256xbf16>
    %7 = arith.index_cast %4 : i32 to index
    %c0_4 = arith.constant 0 : index
    %8 = vector.load %arg3[%7, %c0_4] : memref<256x128xbf16, #tpu.memory_space<vmem>>, vector<256x128xbf16>
    %cst = arith.constant dense<0.000000e+00> : vector<256x128xf32>
    %9 = tpu.matmul %6, %8, %cst {dimension_numbers = #tpu.dot_dimension_numbers<[1], [0], [0], [1], [0, 0, 1, 1], [], []>} : vector<256x256xbf16>, vector<256x128xbf16>, vector<256x128xf32> -> vector<256x128xf32>
    %10 = arith.addf %5, %9 : vector<256x128xf32>
    %c0_5 = arith.constant 0 : index
    %c0_6 = arith.constant 0 : index
    %11 = vector.load %arg4[%c0_5, %c0_6] : memref<256x128xf32, #tpu.memory_space<vmem>>, vector<256x128xf32>
    tpu.vector_store %arg4[%c0_5, %c0_6], %10 {strides = array<i32>} : memref<256x128xf32, #tpu.memory_space<vmem>>, vector<256x128xf32>,
    return
  }
  func.func @transform_0(%arg0: i32, %arg1: i32) -> (i32, i32) {
    %c0_i32 = arith.constant 0 : i32
    return %arg0, %arg1 : i32, i32
  }
  func.func @transform_1(%arg0: i32, %arg1: i32) -> (i32, i32) {
    %c0_i32 = arith.constant 0 : i32
    %c0_i32_0 = arith.constant 0 : i32
    %c0_i32_1 = arith.constant 0 : i32
    return %c0_i32, %c0_i32_0 : i32, i32
  }
  func.func @transform_2(%arg0: i32, %arg1: i32) -> (i32, i32) {
    %c0_i32 = arith.constant 0 : i32
    %c0_i32_0 = arith.constant 0 : i32
    return %arg0, %c0_i32 : i32, i32
  }
}

</mosaic_0001>

<bundles_post_ra>
// kernel: simple_gcn_forward.3
= control target key start
LH: loop header
LB: loop body
LE: loop exit
PB: predicated region body
PF: predicated region fallthrough
CT: control target
= control target key end

     0   :  { %s1132_s1 = inlined_call_operand.vmem [shape: bf16[256,128], index: 1, kind: input, shape index: {}]   ;;  %s1133_s0 = inlined_call_operand.vmem [shape: bf16[256,256], index: 0, kind: input, shape index: {}]   ;;  %s1134_s2 = inlined_call_operand.vmem [shape: f32[256,128], index: 2, kind: output, shape index: {}]  }
   0x1   :  { %v813_v0 = vld [vmem:[%s1132_s1 + $0x40] sm:$0xff]   ;;  %v815_v2 = vld [vmem:[%s1132_s1 + $0x48] sm:$0xff]   ;;  %v817_v4 = vld [vmem:[%s1132_s1 + $0x50] sm:$0xff]  }
   0x2   :  { %v814_v1 = vld [vmem:[%s1132_s1] sm:$0xff]   ;;  %684 = vmatprep.subr.bf16.mxu0 %v813_v0  ;;  %796 = vmatprep.subr.bf16.mxu1 %v813_v0  ;;  %v816_v3 = vld [vmem:[%s1132_s1 + $0x8] sm:$0xff]   ;;  %v818_v5 = vld [vmem:[%s1132_s1 + $0x10] sm:$0xff]  }
   0x3   :  { %685 = vmatpush3.bf16.msra.mxu0 %v814_v1  ;;  %804 = vmatpush3.bf16.msra.mxu1 %v814_v1  ;;  %v819_v6 = vld [vmem:[%s1132_s1 + $0x58] sm:$0xff]   ;;  %v821_v8 = vld [vmem:[%s1132_s1 + $0x60] sm:$0xff]   ;;  %v823_v10 = vld [vmem:[%s1132_s1 + $0x68] sm:$0xff]  }
   0x4   :  { %686 = vmatprep.subr.bf16.mxu0 %v815_v2  ;;  %797 = vmatprep.subr.bf16.mxu1 %v815_v2  ;;  %v820_v7 = vld [vmem:[%s1132_s1 + $0x18] sm:$0xff]   ;;  %v822_v9 = vld [vmem:[%s1132_s1 + $0x20] sm:$0xff]   ;;  %v824_v13 = vld [vmem:[%s1132_s1 + $0x28] sm:$0xff]  }
   0x5   :  { %v831_v11 = vld [vmem:[%s1133_s0 + $0x4] ss:$8 sps:$4 sm:$0xff]   ;;  %v825_v14 = vld [vmem:[%s1132_s1 + $0x70] sm:$0xff]   ;;  %v827_v16 = vld [vmem:[%s1132_s1 + $0x78] sm:$0xff]  }
   0x6   :  { %v834_v12 = vld [vmem:[%s1133_s0 + $0x84] ss:$8 sps:$4 sm:$0xff]   ;;  %437 = vmatprep.mubr.bf16.mxu0 %v831_v11  ;;  %v826_v15 = vld [vmem:[%s1132_s1 + $0x30] sm:$0xff]   ;;  %v828_v17 = vld [vmem:[%s1132_s1 + $0x38] sm:$0xff]  }
   0x7   :  { %687 = vmatpush3.bf16.msra.mxu0 %v816_v3  ;;  %805 = vmatpush3.bf16.msra.mxu1 %v816_v3  ;;  %v829_v18 = vld [vmem:[%s1133_s0] ss:$8 sps:$4 sm:$0xff]   ;;  %v835_v20 = vld [vmem:[%s1133_s0 + $0x14] ss:$8 sps:$4 sm:$0xff]   ;;  %v839_v22 = vld [vmem:[%s1133_s0 + $0x10] ss:$8 sps:$4 sm:$0xff]  }
   0x8   :  { %688 = vmatprep.subr.bf16.mxu0 %v817_v4  ;;  %798 = vmatprep.subr.bf16.mxu1 %v817_v4  ;;  %v832_v19 = vld [vmem:[%s1133_s0 + $0x80] ss:$8 sps:$4 sm:$0xff]   ;;  %v837_v21 = vld [vmem:[%s1133_s0 + $0x94] ss:$8 sps:$4 sm:$0xff]   ;;  %v840_v23 = vld [vmem:[%s1133_s0 + $0x90] ss:$8 sps:$4 sm:$0xff]  }
   0x9   :  { %501 = vmatprep.mubr.bf16.mxu1 %v834_v12  ;;  %v841_v24 = vld [vmem:[%s1133_s0 + $0x24] ss:$8 sps:$4 sm:$0xff]   ;;  %v845_v26 = vld [vmem:[%s1133_s0 + $0x20] ss:$8 sps:$4 sm:$0xff]   ;;  %v847_v28 = vld [vmem:[%s1133_s0 + $0x34] ss:$8 sps:$4 sm:$0xff]  }
   0xa   :  { %v843_v25 = vld [vmem:[%s1133_s0 + $0xa4] ss:$8 sps:$4 sm:$0xff]   ;;  %v846_v27 = vld [vmem:[%s1133_s0 + $0xa0] ss:$8 sps:$4 sm:$0xff]   ;;  %v849_v29 = vld [vmem:[%s1133_s0 + $0xb4] ss:$8 sps:$4 sm:$0xff]  }
   0xb   :  { %689 = vmatpush3.bf16.msra.mxu0 %v818_v5  ;;  %806 = vmatpush3.bf16.msra.mxu1 %v818_v5  ;;  %v851_v30 = vld [vmem:[%s1133_s0 + $0x30] ss:$8 sps:$4 sm:$0xff]   ;;  %v853_v32 = vld [vmem:[%s1133_s0 + $0x44] ss:$8 sps:$4 sm:$0xff]   ;;  %v857_v34 = vld [vmem:[%s1133_s0 + $0x40] ss:$8 sps:$4 sm:$0xff]  }
   0xc   :  { %690 = vmatprep.subr.bf16.mxu0 %v819_v6  ;;  %799 = vmatprep.subr.bf16.mxu1 %v819_v6  ;;  %v852_v31 = vld [vmem:[%s1133_s0 + $0xb0] ss:$8 sps:$4 sm:$0xff]   ;;  %v855_v33 = vld [vmem:[%s1133_s0 + $0xc4] ss:$8 sps:$4 sm:$0xff]   ;;  %v858_v35 = vld [vmem:[%s1133_s0 + $0xc0] ss:$8 sps:$4 sm:$0xff]  }
   0xd   :  { %v859_v36 = vld [vmem:[%s1133_s0 + $0x54] ss:$8 sps:$4 sm:$0xff]   ;;  %v863_v38 = vld [vmem:[%s1133_s0 + $0x50] ss:$8 sps:$4 sm:$0xff]   ;;  %v865_v40 = vld [vmem:[%s1133_s0 + $0x64] ss:$8 sps:$4 sm:$0xff]  }
   0xe   :  { %v861_v37 = vld [vmem:[%s1133_s0 + $0xd4] ss:$8 sps:$4 sm:$0xff]   ;;  %v864_v39 = vld [vmem:[%s1133_s0 + $0xd0] ss:$8 sps:$4 sm:$0xff]   ;;  %v867_v41 = vld [vmem:[%s1133_s0 + $0xe4] ss:$8 sps:$4 sm:$0xff]  }
   0xf   :  { %691 = vmatpush3.bf16.msra.mxu0 %v820_v7  ;;  %807 = vmatpush3.bf16.msra.mxu1 %v820_v7  ;;  %v869_v42 = vld [vmem:[%s1133_s0 + $0x60] ss:$8 sps:$4 sm:$0xff]   ;;  %v871_v44 = vld [vmem:[%s1133_s0 + $0x74] ss:$8 sps:$4 sm:$0xff]   ;;  %v875_v46 = vld [vmem:[%s1133_s0 + $0x70] ss:$8 sps:$4 sm:$0xff]  }
  0x10   :  { %692 = vmatprep.subr.bf16.mxu0 %v821_v8  ;;  %800 = vmatprep.subr.bf16.mxu1 %v821_v8  ;;  %v870_v43 = vld [vmem:[%s1133_s0 + $0xe0] ss:$8 sps:$4 sm:$0xff]   ;;  %v873_v45 = vld [vmem:[%s1133_s0 + $0xf4] ss:$8 sps:$4 sm:$0xff]   ;;  %v876_v47 = vld [vmem:[%s1133_s0 + $0xf0] ss:$8 sps:$4 sm:$0xff]  }
  0x13   :  { %693 = vmatpush3.bf16.msra.mxu0 %v822_v9  ;;  %808 = vmatpush3.bf16.msra.mxu1 %v822_v9 }
  0x14   :  { %694 = vmatprep.subr.bf16.mxu0 %v823_v10  ;;  %801 = vmatprep.subr.bf16.mxu1 %v823_v10 }
  0x17   :  { %695 = vmatpush3.bf16.msra.mxu0 %v824_v13  ;;  %809 = vmatpush3.bf16.msra.mxu1 %v824_v13 }
  0x18   :  { %696 = vmatprep.subr.bf16.mxu0 %v825_v14  ;;  %802 = vmatprep.subr.bf16.mxu1 %v825_v14 }
  0x1b   :  { %697 = vmatpush3.bf16.msra.mxu0 %v826_v15  ;;  %810 = vmatpush3.bf16.msra.mxu1 %v826_v15 }
  0x1c   :  { %698 = vmatprep.subr.bf16.mxu0 %v827_v16  ;;  %803 = vmatprep.subr.bf16.mxu1 %v827_v16 }
  0x1f   :  { %699 = vmatpush3.bf16.msra.mxu0 %v828_v17  ;;  %811 = vmatpush3.bf16.msra.mxu1 %v828_v17 }
  0x22   :  { %438 = vmatmul.mubr.bf16.vlgmr.msra.gmra.mrb[0].mxu0 %v829_v18  ;;  %502 = vmatmul.mubr.bf16.vlgmr.msra.gmra.mrb[0].mxu1 %v832_v19 }
  0x23   :  { %445 = vmatprep.mubr.bf16.mxu0 %v835_v20  ;;  %509 = vmatprep.mubr.bf16.mxu1 %v837_v21 }
  0x2a   :  { %446 = vmatmul.mubr.bf16.gmra.mrb[4].mxu0 %v839_v22  ;;  %510 = vmatmul.mubr.bf16.gmra.mrb[4].mxu1 %v840_v23 }
  0x2b   :  { %453 = vmatprep.mubr.bf16.mxu0 %v841_v24  ;;  %517 = vmatprep.mubr.bf16.mxu1 %v843_v25 }
  0x32   :  { %454 = vmatmul.mubr.bf16.gmra.mrb[8].mxu0 %v845_v26  ;;  %518 = vmatmul.mubr.bf16.gmra.mrb[8].mxu1 %v846_v27 }
  0x33   :  { %461 = vmatprep.mubr.bf16.mxu0 %v847_v28  ;;  %525 = vmatprep.mubr.bf16.mxu1 %v849_v29 }
  0x3a   :  { %462 = vmatmul.mubr.bf16.gmra.mrb[12].mxu0 %v851_v30  ;;  %526 = vmatmul.mubr.bf16.gmra.mrb[12].mxu1 %v852_v31 }
  0x3b   :  { %469 = vmatprep.mubr.bf16.mxu0 %v853_v32  ;;  %533 = vmatprep.mubr.bf16.mxu1 %v855_v33 }
  0x42   :  { %470 = vmatmul.mubr.bf16.gmra.mrb[16].mxu0 %v857_v34  ;;  %534 = vmatmul.mubr.bf16.gmra.mrb[16].mxu1 %v858_v35 }
  0x43   :  { %477 = vmatprep.mubr.bf16.mxu0 %v859_v36  ;;  %541 = vmatprep.mubr.bf16.mxu1 %v861_v37 }
  0x4a   :  { %478 = vmatmul.mubr.bf16.gmra.mrb[20].mxu0 %v863_v38  ;;  %542 = vmatmul.mubr.bf16.gmra.mrb[20].mxu1 %v864_v39 }
  0x4b   :  { %485 = vmatprep.mubr.bf16.mxu0 %v865_v40  ;;  %549 = vmatprep.mubr.bf16.mxu1 %v867_v41 }
  0x52   :  { %486 = vmatmul.mubr.bf16.gmra.mrb[24].mxu0 %v869_v42  ;;  %550 = vmatmul.mubr.bf16.gmra.mrb[24].mxu1 %v870_v43 }
  0x53   :  { %493 = vmatprep.mubr.bf16.mxu0 %v871_v44  ;;  %557 = vmatprep.mubr.bf16.mxu1 %v873_v45 }
  0x5a   :  { %494 = vmatmul.mubr.bf16.gmra.mrb[28].mxu0 %v875_v46  ;;  %558 = vmatmul.mubr.bf16.gmra.mrb[28].mxu1 %v876_v47 }
  0xf5   :  { %v700_v48 = vpop.f32.mrb[0].mxu0  ;;  %v748_v49 = vpop.f32.mrb[0].mxu1 }
  0xf6   :  { %v701_v50 = vpop.f32.mrb[1].mxu0  ;;  %v749_v51 = vpop.f32.mrb[1].mxu1 }
  0xf7   :  { %v702_v52 = vadd.f32 %v701_v50, %v700_v48  ;;  %v750_v53 = vadd.f32 %v749_v51, %v748_v49  ;;  %v703_v54 = vpop.f32.mrb[2].mxu0  ;;  %v751_v55 = vpop.f32.mrb[2].mxu1 }
  0xf8   :  { %v704_v56 = vpop.f32.mrb[3].mxu0  ;;  %v752_v57 = vpop.f32.mrb[3].mxu1 }
  0xf9   :  { %v705_v58 = vadd.f32 %v704_v56, %v703_v54  ;;  %v753_v59 = vadd.f32 %v752_v57, %v751_v55  ;;  %598 = vst [vmem:[%s1134_s2] sm:$0xff] %v702_v52  ;;  %614 = vst [vmem:[%s1134_s2 + $0x80] sm:$0xff] %v750_v53 }
  0xfb   :  { %599 = vst [vmem:[%s1134_s2 + $0x8] sm:$0xff] %v705_v58  ;;  %615 = vst [vmem:[%s1134_s2 + $0x88] sm:$0xff] %v753_v59 }
  0xfd   :  { %v706_v60 = vpop.f32.mrb[4].mxu0  ;;  %v754_v61 = vpop.f32.mrb[4].mxu1 }
  0xfe   :  { %v707_v62 = vpop.f32.mrb[5].mxu0  ;;  %v755_v63 = vpop.f32.mrb[5].mxu1 }
  0xff   :  { %v708_v0 = vadd.f32 %v707_v62, %v706_v60  ;;  %v756_v1 = vadd.f32 %v755_v63, %v754_v61  ;;  %v709_v2 = vpop.f32.mrb[6].mxu0  ;;  %v757_v3 = vpop.f32.mrb[6].mxu1 }
 0x100   :  { %v710_v4 = vpop.f32.mrb[7].mxu0  ;;  %v758_v5 = vpop.f32.mrb[7].mxu1 }
 0x101   :  { %v711_v6 = vadd.f32 %v710_v4, %v709_v2  ;;  %v759_v7 = vadd.f32 %v758_v5, %v757_v3  ;;  %600 = vst [vmem:[%s1134_s2 + $0x10] sm:$0xff] %v708_v0  ;;  %616 = vst [vmem:[%s1134_s2 + $0x90] sm:$0xff] %v756_v1 }
 0x103   :  { %601 = vst [vmem:[%s1134_s2 + $0x18] sm:$0xff] %v711_v6  ;;  %617 = vst [vmem:[%s1134_s2 + $0x98] sm:$0xff] %v759_v7 }
 0x105   :  { %v712_v8 = vpop.f32.mrb[8].mxu0  ;;  %v760_v9 = vpop.f32.mrb[8].mxu1 }
 0x106   :  { %v713_v10 = vpop.f32.mrb[9].mxu0  ;;  %v761_v11 = vpop.f32.mrb[9].mxu1 }
 0x107   :  { %v714_v12 = vadd.f32 %v713_v10, %v712_v8  ;;  %v762_v13 = vadd.f32 %v761_v11, %v760_v9  ;;  %v715_v14 = vpop.f32.mrb[10].mxu0  ;;  %v763_v15 = vpop.f32.mrb[10].mxu1 }
 0x108   :  { %v716_v16 = vpop.f32.mrb[11].mxu0  ;;  %v764_v17 = vpop.f32.mrb[11].mxu1 }
 0x109   :  { %v717_v18 = vadd.f32 %v716_v16, %v715_v14  ;;  %v765_v19 = vadd.f32 %v764_v17, %v763_v15  ;;  %602 = vst [vmem:[%s1134_s2 + $0x20] sm:$0xff] %v714_v12  ;;  %618 = vst [vmem:[%s1134_s2 + $0xa0] sm:$0xff] %v762_v13 }
 0x10b   :  { %603 = vst [vmem:[%s1134_s2 + $0x28] sm:$0xff] %v717_v18  ;;  %619 = vst [vmem:[%s1134_s2 + $0xa8] sm:$0xff] %v765_v19 }
 0x10d   :  { %v718_v20 = vpop.f32.mrb[12].mxu0  ;;  %v766_v21 = vpop.f32.mrb[12].mxu1 }
 0x10e   :  { %v719_v22 = vpop.f32.mrb[13].mxu0  ;;  %v767_v23 = vpop.f32.mrb[13].mxu1 }
 0x10f   :  { %v720_v24 = vadd.f32 %v719_v22, %v718_v20  ;;  %v768_v25 = vadd.f32 %v767_v23, %v766_v21  ;;  %v721_v26 = vpop.f32.mrb[14].mxu0  ;;  %v769_v27 = vpop.f32.mrb[14].mxu1 }
 0x110   :  { %v722_v28 = vpop.f32.mrb[15].mxu0  ;;  %v770_v29 = vpop.f32.mrb[15].mxu1 }
 0x111   :  { %v723_v30 = vadd.f32 %v722_v28, %v721_v26  ;;  %v771_v31 = vadd.f32 %v770_v29, %v769_v27  ;;  %604 = vst [vmem:[%s1134_s2 + $0x30] sm:$0xff] %v720_v24  ;;  %620 = vst [vmem:[%s1134_s2 + $0xb0] sm:$0xff] %v768_v25 }
 0x113   :  { %605 = vst [vmem:[%s1134_s2 + $0x38] sm:$0xff] %v723_v30  ;;  %621 = vst [vmem:[%s1134_s2 + $0xb8] sm:$0xff] %v771_v31 }
 0x115   :  { %v724_v32 = vpop.f32.mrb[16].mxu0  ;;  %v772_v33 = vpop.f32.mrb[16].mxu1 }
 0x116   :  { %v725_v34 = vpop.f32.mrb[17].mxu0  ;;  %v773_v35 = vpop.f32.mrb[17].mxu1 }
 0x117   :  { %v726_v36 = vadd.f32 %v725_v34, %v724_v32  ;;  %v774_v37 = vadd.f32 %v773_v35, %v772_v33  ;;  %v727_v38 = vpop.f32.mrb[18].mxu0  ;;  %v775_v39 = vpop.f32.mrb[18].mxu1 }
 0x118   :  { %v728_v40 = vpop.f32.mrb[19].mxu0  ;;  %v776_v41 = vpop.f32.mrb[19].mxu1 }
 0x119   :  { %v729_v42 = vadd.f32 %v728_v40, %v727_v38  ;;  %v777_v43 = vadd.f32 %v776_v41, %v775_v39  ;;  %606 = vst [vmem:[%s1134_s2 + $0x40] sm:$0xff] %v726_v36  ;;  %622 = vst [vmem:[%s1134_s2 + $0xc0] sm:$0xff] %v774_v37 }
 0x11b   :  { %607 = vst [vmem:[%s1134_s2 + $0x48] sm:$0xff] %v729_v42  ;;  %623 = vst [vmem:[%s1134_s2 + $0xc8] sm:$0xff] %v777_v43 }
 0x11d   :  { %v730_v44 = vpop.f32.mrb[20].mxu0  ;;  %v778_v45 = vpop.f32.mrb[20].mxu1 }
 0x11e   :  { %v731_v46 = vpop.f32.mrb[21].mxu0  ;;  %v779_v47 = vpop.f32.mrb[21].mxu1 }
 0x11f   :  { %v732_v48 = vadd.f32 %v731_v46, %v730_v44  ;;  %v780_v49 = vadd.f32 %v779_v47, %v778_v45  ;;  %v733_v50 = vpop.f32.mrb[22].mxu0  ;;  %v781_v51 = vpop.f32.mrb[22].mxu1 }
 0x120   :  { %v734_v52 = vpop.f32.mrb[23].mxu0  ;;  %v782_v53 = vpop.f32.mrb[23].mxu1 }
 0x121   :  { %v735_v54 = vadd.f32 %v734_v52, %v733_v50  ;;  %v783_v55 = vadd.f32 %v782_v53, %v781_v51  ;;  %608 = vst [vmem:[%s1134_s2 + $0x50] sm:$0xff] %v732_v48  ;;  %624 = vst [vmem:[%s1134_s2 + $0xd0] sm:$0xff] %v780_v49 }
 0x123   :  { %609 = vst [vmem:[%s1134_s2 + $0x58] sm:$0xff] %v735_v54  ;;  %625 = vst [vmem:[%s1134_s2 + $0xd8] sm:$0xff] %v783_v55 }
 0x125   :  { %v736_v56 = vpop.f32.mrb[24].mxu0  ;;  %v784_v57 = vpop.f32.mrb[24].mxu1 }
 0x126   :  { %v737_v58 = vpop.f32.mrb[25].mxu0  ;;  %v785_v59 = vpop.f32.mrb[25].mxu1 }
 0x127   :  { %v738_v60 = vadd.f32 %v737_v58, %v736_v56  ;;  %v786_v61 = vadd.f32 %v785_v59, %v784_v57  ;;  %v739_v62 = vpop.f32.mrb[26].mxu0  ;;  %v787_v63 = vpop.f32.mrb[26].mxu1 }
 0x128   :  { %v740_v0 = vpop.f32.mrb[27].mxu0  ;;  %v788_v1 = vpop.f32.mrb[27].mxu1 }
 0x129   :  { %v741_v2 = vadd.f32 %v740_v0, %v739_v62  ;;  %v789_v3 = vadd.f32 %v788_v1, %v787_v63  ;;  %610 = vst [vmem:[%s1134_s2 + $0x60] sm:$0xff] %v738_v60  ;;  %626 = vst [vmem:[%s1134_s2 + $0xe0] sm:$0xff] %v786_v61 }
 0x12b   :  { %611 = vst [vmem:[%s1134_s2 + $0x68] sm:$0xff] %v741_v2  ;;  %627 = vst [vmem:[%s1134_s2 + $0xe8] sm:$0xff] %v789_v3 }
 0x12d   :  { %v742_v4 = vpop.f32.mrb[28].mxu0  ;;  %v790_v5 = vpop.f32.mrb[28].mxu1 }
 0x12e   :  { %v743_v6 = vpop.f32.mrb[29].mxu0  ;;  %v791_v7 = vpop.f32.mrb[29].mxu1 }
 0x12f   :  { %v744_v8 = vadd.f32 %v743_v6, %v742_v4  ;;  %v792_v9 = vadd.f32 %v791_v7, %v790_v5  ;;  %v745_v10 = vpop.f32.mrb[30].mxu0  ;;  %v793_v11 = vpop.f32.mrb[30].mxu1 }
 0x130   :  { %v746_v12 = vpop.f32.mrb[31].mxu0  ;;  %v794_v13 = vpop.f32.mrb[31].mxu1 }
 0x131   :  { %v747_v14 = vadd.f32 %v746_v12, %v745_v10  ;;  %v795_v15 = vadd.f32 %v794_v13, %v793_v11  ;;  %612 = vst [vmem:[%s1134_s2 + $0x70] sm:$0xff] %v744_v8  ;;  %628 = vst [vmem:[%s1134_s2 + $0xf0] sm:$0xff] %v792_v9 }
 0x133   :  { %613 = vst [vmem:[%s1134_s2 + $0x78] sm:$0xff] %v747_v14  ;;  %629 = vst [vmem:[%s1134_s2 + $0xf8] sm:$0xff] %v795_v15 }

// kernel: simple_gcn_forward.2
= control target key start
LH: loop header
LB: loop body
LE: loop exit
PB: predicated region body
PF: predicated region fallthrough
CT: control target
= control target key end

     0   :  { %7 = vsyncpa [#allocation4], 0  ;;  %s1272_s9 = smov [#allocation3]   ;;  %s1398_s0 = inlined_call_operand.hbm [shape: bf16[256,256], index: 0, kind: input, shape index: {}]   ;;  %s1399_s1 = inlined_call_operand.vmem [shape: bf16[256,128], index: 1, kind: input, shape index: {}]   ;;  %s1400_s2 = inlined_call_operand.vmem [shape: bf16[256,128], index: 2, kind: output, shape index: {}]  }
   0x1   :  { %s13_s10 = sshll.u32 %s1272_s9, 4  ;;  %s1248_s13 = scalar_lea.hbm %s1398_s0, 4096  ;;  %s14_s10 = int_to_ptr.vmem [resolvable:$true] %s13_s10 }
   0x2   :  { %p1249_p0 = scmp.ne.s32.totalorder %s1398_s0, %s1248_s13  ;;  %p1252_p1 = scmp.lt.u32.totalorder %s1248_s13, %s1398_s0 }
   0x4   :  { %p1254_p2 = pnand %p1252_p1, %p1249_p0 }
   0x6   :  { %1257 = shalt.err (!%p1254_p2)
}
   0x7   :  { %s1258_s18 = scalar_lea.vmem %s14_s10, 4096  ;;  %p1263_p4 = scmp.lt.s32.totalorder %s14_s10, %s14_s10 }
   0x8   :  { %p1259_p3 = scmp.ne.s32.totalorder %s14_s10, %s1258_s18  ;;  %p1264_p5 = scmp.lt.s32.totalorder %s1258_s18, %s1258_s18 }
   0xa   :  { %p1265_p6 = por %p1264_p5, %p1263_p4 }
   0xc   :  { %p1266_p7 = pnand %p1265_p6, %p1259_p3 }
   0xe   :  { %1269 = shalt.err (!%p1266_p7)
}
   0xf   :  { %s1273_s19 = smov 128   ;;  %s1274_s20 = smov 8  }
  0x10   :  { %19 = dma.hbm_to_vmem [thread:$0]  %s1398_s0, 4096, %s14_s10, [#allocation4], %s1273_s19, %s1273_s19, %s1274_s20  }
  0x11   :  { %1270 = dma.done.wait [#allocation4], 4096  }
  0x12   :  { %1271 = vsyncadd [#allocation4], 4294963200  ;;  %v1184_v0 = vld [vmem:[%s1399_s1 + $0x40] sm:$0xff]   ;;  %v1186_v2 = vld [vmem:[%s1399_s1 + $0x48] sm:$0xff]  }
  0x13   :  { %v1185_v1 = vld [vmem:[%s1399_s1] sm:$0xff]   ;;  %1053 = vmatprep.subr.bf16.mxu0 %v1184_v0  ;;  %1165 = vmatprep.subr.bf16.mxu1 %v1184_v0  ;;  %v1187_v3 = vld [vmem:[%s1399_s1 + $0x8] sm:$0xff]   ;;  %v1188_v4 = vld [vmem:[%s1399_s1 + $0x50] sm:$0xff]  }
  0x14   :  { %1054 = vmatpush3.bf16.msra.mxu0 %v1185_v1  ;;  %1173 = vmatpush3.bf16.msra.mxu1 %v1185_v1  ;;  %v1189_v5 = vld [vmem:[%s1399_s1 + $0x10] sm:$0xff]   ;;  %v1190_v6 = vld [vmem:[%s1399_s1 + $0x58] sm:$0xff]   ;;  %v1192_v8 = vld [vmem:[%s1399_s1 + $0x60] sm:$0xff]  }
  0x15   :  { %1055 = vmatprep.subr.bf16.mxu0 %v1186_v2  ;;  %1166 = vmatprep.subr.bf16.mxu1 %v1186_v2  ;;  %v1191_v7 = vld [vmem:[%s1399_s1 + $0x18] sm:$0xff]   ;;  %v1193_v9 = vld [vmem:[%s1399_s1 + $0x20] sm:$0xff]   ;;  %v1194_v10 = vld [vmem:[%s1399_s1 + $0x68] sm:$0xff]  }
  0x16   :  { %v1202_v11 = vld [vmem:[#allocation3 + $0x4] ss:$8 sps:$4 sm:$0xff]   ;;  %v1196_v14 = vld [vmem:[%s1399_s1 + $0x70] sm:$0xff]   ;;  %v1198_v16 = vld [vmem:[%s1399_s1 + $0x78] sm:$0xff]  }
  0x17   :  { %v1205_v12 = vld [vmem:[#allocation3 + $0x84] ss:$8 sps:$4 sm:$0xff]   ;;  %451 = vmatprep.mubr.bf16.mxu0 %v1202_v11  ;;  %v1197_v15 = vld [vmem:[%s1399_s1 + $0x30] sm:$0xff]   ;;  %v1199_v17 = vld [vmem:[%s1399_s1 + $0x38] sm:$0xff]  }
  0x18   :  { %1056 = vmatpush3.bf16.msra.mxu0 %v1187_v3  ;;  %1174 = vmatpush3.bf16.msra.mxu1 %v1187_v3  ;;  %v1195_v13 = vld [vmem:[%s1399_s1 + $0x28] sm:$0xff]   ;;  %v1206_v20 = vld [vmem:[#allocation3 + $0x14] ss:$8 sps:$4 sm:$0xff]   ;;  %v1210_v22 = vld [vmem:[#allocation3 + $0x10] ss:$8 sps:$4 sm:$0xff]  }
  0x19   :  { %1057 = vmatprep.subr.bf16.mxu0 %v1188_v4  ;;  %1167 = vmatprep.subr.bf16.mxu1 %v1188_v4  ;;  %v1200_v18 = vld [vmem:[#allocation3] ss:$8 sps:$4 sm:$0xff]   ;;  %v1208_v21 = vld [vmem:[#allocation3 + $0x94] ss:$8 sps:$4 sm:$0xff]   ;;  %v1211_v23 = vld [vmem:[#allocation3 + $0x90] ss:$8 sps:$4 sm:$0xff]  }
  0x1a   :  { %515 = vmatprep.mubr.bf16.mxu1 %v1205_v12  ;;  %v1203_v19 = vld [vmem:[#allocation3 + $0x80] ss:$8 sps:$4 sm:$0xff]   ;;  %v1212_v24 = vld [vmem:[#allocation3 + $0x24] ss:$8 sps:$4 sm:$0xff]   ;;  %v1218_v28 = vld [vmem:[#allocation3 + $0x34] ss:$8 sps:$4 sm:$0xff]  }
  0x1b   :  { %v1214_v25 = vld [vmem:[#allocation3 + $0xa4] ss:$8 sps:$4 sm:$0xff]   ;;  %v1216_v26 = vld [vmem:[#allocation3 + $0x20] ss:$8 sps:$4 sm:$0xff]   ;;  %v1220_v29 = vld [vmem:[#allocation3 + $0xb4] ss:$8 sps:$4 sm:$0xff]  }
  0x1c   :  { %1058 = vmatpush3.bf16.msra.mxu0 %v1189_v5  ;;  %1175 = vmatpush3.bf16.msra.mxu1 %v1189_v5  ;;  %v1217_v27 = vld [vmem:[#allocation3 + $0xa0] ss:$8 sps:$4 sm:$0xff]   ;;  %v1222_v30 = vld [vmem:[#allocation3 + $0x30] ss:$8 sps:$4 sm:$0xff]   ;;  %v1224_v32 = vld [vmem:[#allocation3 + $0x44] ss:$8 sps:$4 sm:$0xff]  }
  0x1d   :  { %1059 = vmatprep.subr.bf16.mxu0 %v1190_v6  ;;  %1168 = vmatprep.subr.bf16.mxu1 %v1190_v6  ;;  %v1223_v31 = vld [vmem:[#allocation3 + $0xb0] ss:$8 sps:$4 sm:$0xff]   ;;  %v1226_v33 = vld [vmem:[#allocation3 + $0xc4] ss:$8 sps:$4 sm:$0xff]   ;;  %v1228_v34 = vld [vmem:[#allocation3 + $0x40] ss:$8 sps:$4 sm:$0xff]  }
  0x1e   :  { %v1229_v35 = vld [vmem:[#allocation3 + $0xc0] ss:$8 sps:$4 sm:$0xff]   ;;  %v1230_v36 = vld [vmem:[#allocation3 + $0x54] ss:$8 sps:$4 sm:$0xff]   ;;  %v1234_v38 = vld [vmem:[#allocation3 + $0x50] ss:$8 sps:$4 sm:$0xff]  }
  0x1f   :  { %v1232_v37 = vld [vmem:[#allocation3 + $0xd4] ss:$8 sps:$4 sm:$0xff]   ;;  %v1235_v39 = vld [vmem:[#allocation3 + $0xd0] ss:$8 sps:$4 sm:$0xff]   ;;  %v1236_v40 = vld [vmem:[#allocation3 + $0x64] ss:$8 sps:$4 sm:$0xff]  }
  0x20   :  { %1060 = vmatpush3.bf16.msra.mxu0 %v1191_v7  ;;  %1176 = vmatpush3.bf16.msra.mxu1 %v1191_v7  ;;  %v1238_v41 = vld [vmem:[#allocation3 + $0xe4] ss:$8 sps:$4 sm:$0xff]   ;;  %v1240_v42 = vld [vmem:[#allocation3 + $0x60] ss:$8 sps:$4 sm:$0xff]   ;;  %v1242_v44 = vld [vmem:[#allocation3 + $0x74] ss:$8 sps:$4 sm:$0xff]  }
  0x21   :  { %1061 = vmatprep.subr.bf16.mxu0 %v1192_v8  ;;  %1169 = vmatprep.subr.bf16.mxu1 %v1192_v8  ;;  %v1241_v43 = vld [vmem:[#allocation3 + $0xe0] ss:$8 sps:$4 sm:$0xff]   ;;  %v1244_v45 = vld [vmem:[#allocation3 + $0xf4] ss:$8 sps:$4 sm:$0xff]   ;;  %v1246_v46 = vld [vmem:[#allocation3 + $0x70] ss:$8 sps:$4 sm:$0xff]  }
  0x22   :  { %v1247_v47 = vld [vmem:[#allocation3 + $0xf0] ss:$8 sps:$4 sm:$0xff]  }
  0x24   :  { %1062 = vmatpush3.bf16.msra.mxu0 %v1193_v9  ;;  %1177 = vmatpush3.bf16.msra.mxu1 %v1193_v9 }
  0x25   :  { %1063 = vmatprep.subr.bf16.mxu0 %v1194_v10  ;;  %1170 = vmatprep.subr.bf16.mxu1 %v1194_v10 }
  0x28   :  { %1064 = vmatpush3.bf16.msra.mxu0 %v1195_v13  ;;  %1178 = vmatpush3.bf16.msra.mxu1 %v1195_v13 }
  0x29   :  { %1065 = vmatprep.subr.bf16.mxu0 %v1196_v14  ;;  %1171 = vmatprep.subr.bf16.mxu1 %v1196_v14 }
  0x2c   :  { %1066 = vmatpush3.bf16.msra.mxu0 %v1197_v15  ;;  %1179 = vmatpush3.bf16.msra.mxu1 %v1197_v15 }
  0x2d   :  { %1067 = vmatprep.subr.bf16.mxu0 %v1198_v16  ;;  %1172 = vmatprep.subr.bf16.mxu1 %v1198_v16 }
  0x30   :  { %1068 = vmatpush3.bf16.msra.mxu0 %v1199_v17  ;;  %1180 = vmatpush3.bf16.msra.mxu1 %v1199_v17 }
  0x33   :  { %452 = vmatmul.mubr.bf16.vlgmr.msra.gmra.mrb[0].mxu0 %v1200_v18  ;;  %516 = vmatmul.mubr.bf16.vlgmr.msra.gmra.mrb[0].mxu1 %v1203_v19 }
  0x34   :  { %459 = vmatprep.mubr.bf16.mxu0 %v1206_v20  ;;  %523 = vmatprep.mubr.bf16.mxu1 %v1208_v21 }
  0x3b   :  { %460 = vmatmul.mubr.bf16.gmra.mrb[4].mxu0 %v1210_v22  ;;  %524 = vmatmul.mubr.bf16.gmra.mrb[4].mxu1 %v1211_v23 }
  0x3c   :  { %467 = vmatprep.mubr.bf16.mxu0 %v1212_v24  ;;  %531 = vmatprep.mubr.bf16.mxu1 %v1214_v25 }
  0x43   :  { %468 = vmatmul.mubr.bf16.gmra.mrb[8].mxu0 %v1216_v26  ;;  %532 = vmatmul.mubr.bf16.gmra.mrb[8].mxu1 %v1217_v27 }
  0x44   :  { %475 = vmatprep.mubr.bf16.mxu0 %v1218_v28  ;;  %539 = vmatprep.mubr.bf16.mxu1 %v1220_v29 }
  0x4b   :  { %476 = vmatmul.mubr.bf16.gmra.mrb[12].mxu0 %v1222_v30  ;;  %540 = vmatmul.mubr.bf16.gmra.mrb[12].mxu1 %v1223_v31 }
  0x4c   :  { %483 = vmatprep.mubr.bf16.mxu0 %v1224_v32  ;;  %547 = vmatprep.mubr.bf16.mxu1 %v1226_v33 }
  0x53   :  { %484 = vmatmul.mubr.bf16.gmra.mrb[16].mxu0 %v1228_v34  ;;  %548 = vmatmul.mubr.bf16.gmra.mrb[16].mxu1 %v1229_v35 }
  0x54   :  { %491 = vmatprep.mubr.bf16.mxu0 %v1230_v36  ;;  %555 = vmatprep.mubr.bf16.mxu1 %v1232_v37 }
  0x5b   :  { %492 = vmatmul.mubr.bf16.gmra.mrb[20].mxu0 %v1234_v38  ;;  %556 = vmatmul.mubr.bf16.gmra.mrb[20].mxu1 %v1235_v39 }
  0x5c   :  { %499 = vmatprep.mubr.bf16.mxu0 %v1236_v40  ;;  %563 = vmatprep.mubr.bf16.mxu1 %v1238_v41 }
  0x63   :  { %500 = vmatmul.mubr.bf16.gmra.mrb[24].mxu0 %v1240_v42  ;;  %564 = vmatmul.mubr.bf16.gmra.mrb[24].mxu1 %v1241_v43 }
  0x64   :  { %507 = vmatprep.mubr.bf16.mxu0 %v1242_v44  ;;  %571 = vmatprep.mubr.bf16.mxu1 %v1244_v45 }
  0x6b   :  { %508 = vmatmul.mubr.bf16.gmra.mrb[28].mxu0 %v1246_v46  ;;  %572 = vmatmul.mubr.bf16.gmra.mrb[28].mxu1 %v1247_v47 }
 0x106   :  { %v1069_v48 = vpop.f32.mrb[0].mxu0  ;;  %v1117_v49 = vpop.f32.mrb[0].mxu1 }
 0x107   :  { %v1070_v50 = vpop.f32.mrb[1].mxu0  ;;  %v1118_v51 = vpop.f32.mrb[1].mxu1 }
 0x108   :  { %v1071_v52 = vadd.f32 %v1070_v50, %v1069_v48  ;;  %v1119_v53 = vadd.f32 %v1118_v51, %v1117_v49  ;;  %v1072_v54 = vpop.f32.mrb[2].mxu0  ;;  %v1120_v55 = vpop.f32.mrb[2].mxu1 }
 0x109   :  { %v1073_v56 = vpop.f32.mrb[3].mxu0  ;;  %v1121_v57 = vpop.f32.mrb[3].mxu1 }
 0x10a   :  { %v1074_v58 = vadd.f32 %v1073_v56, %v1072_v54  ;;  %v1122_v59 = vadd.f32 %v1121_v57, %v1120_v55 }
 0x10c   :  { %v961_v60 = vpack.c.bf16 %v1074_v58, %v1071_v52  ;;  %v1001_v61 = vpack.c.bf16 %v1122_v59, %v1119_v53 }
 0x10e   :  { %962 = vst [vmem:[%s1400_s2] sm:$0xff] %v961_v60   ;;  %1045 = vst [vmem:[%s1400_s2 + $0x40] sm:$0xff] %v1001_v61   ;;  %v1075_v62 = vpop.f32.mrb[4].mxu0  ;;  %v1123_v63 = vpop.f32.mrb[4].mxu1 }
 0x10f   :  { %v1076_v0 = vpop.f32.mrb[5].mxu0  ;;  %v1124_v1 = vpop.f32.mrb[5].mxu1 }
 0x110   :  { %v1077_v2 = vadd.f32 %v1076_v0, %v1075_v62  ;;  %v1125_v3 = vadd.f32 %v1124_v1, %v1123_v63  ;;  %v1078_v4 = vpop.f32.mrb[6].mxu0  ;;  %v1126_v5 = vpop.f32.mrb[6].mxu1 }
 0x111   :  { %v1079_v6 = vpop.f32.mrb[7].mxu0  ;;  %v1127_v7 = vpop.f32.mrb[7].mxu1 }
 0x112   :  { %v1080_v8 = vadd.f32 %v1079_v6, %v1078_v4  ;;  %v1128_v9 = vadd.f32 %v1127_v7, %v1126_v5 }
 0x114   :  { %v966_v10 = vpack.c.bf16 %v1080_v8, %v1077_v2  ;;  %v1006_v11 = vpack.c.bf16 %v1128_v9, %v1125_v3 }
 0x116   :  { %1038 = vst [vmem:[%s1400_s2 + $0x8] sm:$0xff] %v966_v10   ;;  %1046 = vst [vmem:[%s1400_s2 + $0x48] sm:$0xff] %v1006_v11   ;;  %v1081_v12 = vpop.f32.mrb[8].mxu0  ;;  %v1129_v13 = vpop.f32.mrb[8].mxu1 }
 0x117   :  { %v1082_v14 = vpop.f32.mrb[9].mxu0  ;;  %v1130_v15 = vpop.f32.mrb[9].mxu1 }
 0x118   :  { %v1083_v16 = vadd.f32 %v1082_v14, %v1081_v12  ;;  %v1131_v17 = vadd.f32 %v1130_v15, %v1129_v13  ;;  %v1084_v18 = vpop.f32.mrb[10].mxu0  ;;  %v1132_v19 = vpop.f32.mrb[10].mxu1 }
 0x119   :  { %v1085_v20 = vpop.f32.mrb[11].mxu0  ;;  %v1133_v21 = vpop.f32.mrb[11].mxu1 }
 0x11a   :  { %v1086_v22 = vadd.f32 %v1085_v20, %v1084_v18  ;;  %v1134_v23 = vadd.f32 %v1133_v21, %v1132_v19 }
 0x11c   :  { %v971_v24 = vpack.c.bf16 %v1086_v22, %v1083_v16  ;;  %v1011_v25 = vpack.c.bf16 %v1134_v23, %v1131_v17 }
 0x11e   :  { %1039 = vst [vmem:[%s1400_s2 + $0x10] sm:$0xff] %v971_v24   ;;  %1047 = vst [vmem:[%s1400_s2 + $0x50] sm:$0xff] %v1011_v25   ;;  %v1087_v26 = vpop.f32.mrb[12].mxu0  ;;  %v1135_v27 = vpop.f32.mrb[12].mxu1 }
 0x11f   :  { %v1088_v28 = vpop.f32.mrb[13].mxu0  ;;  %v1136_v29 = vpop.f32.mrb[13].mxu1 }
 0x120   :  { %v1089_v30 = vadd.f32 %v1088_v28, %v1087_v26  ;;  %v1137_v31 = vadd.f32 %v1136_v29, %v1135_v27  ;;  %v1090_v32 = vpop.f32.mrb[14].mxu0  ;;  %v1138_v33 = vpop.f32.mrb[14].mxu1 }
 0x121   :  { %v1091_v34 = vpop.f32.mrb[15].mxu0  ;;  %v1139_v35 = vpop.f32.mrb[15].mxu1 }
 0x122   :  { %v1092_v36 = vadd.f32 %v1091_v34, %v1090_v32  ;;  %v1140_v37 = vadd.f32 %v1139_v35, %v1138_v33 }
 0x124   :  { %v976_v38 = vpack.c.bf16 %v1092_v36, %v1089_v30  ;;  %v1016_v39 = vpack.c.bf16 %v1140_v37, %v1137_v31 }
 0x126   :  { %1040 = vst [vmem:[%s1400_s2 + $0x18] sm:$0xff] %v976_v38   ;;  %1048 = vst [vmem:[%s1400_s2 + $0x58] sm:$0xff] %v1016_v39   ;;  %v1093_v40 = vpop.f32.mrb[16].mxu0  ;;  %v1141_v41 = vpop.f32.mrb[16].mxu1 }
 0x127   :  { %v1094_v42 = vpop.f32.mrb[17].mxu0  ;;  %v1142_v43 = vpop.f32.mrb[17].mxu1 }
 0x128   :  { %v1095_v44 = vadd.f32 %v1094_v42, %v1093_v40  ;;  %v1143_v45 = vadd.f32 %v1142_v43, %v1141_v41  ;;  %v1096_v46 = vpop.f32.mrb[18].mxu0  ;;  %v1144_v47 = vpop.f32.mrb[18].mxu1 }
 0x129   :  { %v1097_v48 = vpop.f32.mrb[19].mxu0  ;;  %v1145_v49 = vpop.f32.mrb[19].mxu1 }
 0x12a   :  { %v1098_v50 = vadd.f32 %v1097_v48, %v1096_v46  ;;  %v1146_v51 = vadd.f32 %v1145_v49, %v1144_v47 }
 0x12c   :  { %v981_v52 = vpack.c.bf16 %v1098_v50, %v1095_v44  ;;  %v1021_v53 = vpack.c.bf16 %v1146_v51, %v1143_v45 }
 0x12e   :  { %1041 = vst [vmem:[%s1400_s2 + $0x20] sm:$0xff] %v981_v52   ;;  %1049 = vst [vmem:[%s1400_s2 + $0x60] sm:$0xff] %v1021_v53   ;;  %v1099_v54 = vpop.f32.mrb[20].mxu0  ;;  %v1147_v55 = vpop.f32.mrb[20].mxu1 }
 0x12f   :  { %v1100_v56 = vpop.f32.mrb[21].mxu0  ;;  %v1148_v57 = vpop.f32.mrb[21].mxu1 }
 0x130   :  { %v1101_v58 = vadd.f32 %v1100_v56, %v1099_v54  ;;  %v1149_v59 = vadd.f32 %v1148_v57, %v1147_v55  ;;  %v1102_v60 = vpop.f32.mrb[22].mxu0  ;;  %v1150_v61 = vpop.f32.mrb[22].mxu1 }
 0x131   :  { %v1103_v62 = vpop.f32.mrb[23].mxu0  ;;  %v1151_v63 = vpop.f32.mrb[23].mxu1 }
 0x132   :  { %v1104_v0 = vadd.f32 %v1103_v62, %v1102_v60  ;;  %v1152_v1 = vadd.f32 %v1151_v63, %v1150_v61 }
 0x134   :  { %v986_v2 = vpack.c.bf16 %v1104_v0, %v1101_v58  ;;  %v1026_v3 = vpack.c.bf16 %v1152_v1, %v1149_v59 }
 0x136   :  { %1042 = vst [vmem:[%s1400_s2 + $0x28] sm:$0xff] %v986_v2   ;;  %1050 = vst [vmem:[%s1400_s2 + $0x68] sm:$0xff] %v1026_v3   ;;  %v1105_v4 = vpop.f32.mrb[24].mxu0  ;;  %v1153_v5 = vpop.f32.mrb[24].mxu1 }
 0x137   :  { %v1106_v6 = vpop.f32.mrb[25].mxu0  ;;  %v1154_v7 = vpop.f32.mrb[25].mxu1 }
 0x138   :  { %v1107_v8 = vadd.f32 %v1106_v6, %v1105_v4  ;;  %v1155_v9 = vadd.f32 %v1154_v7, %v1153_v5  ;;  %v1108_v10 = vpop.f32.mrb[26].mxu0  ;;  %v1156_v11 = vpop.f32.mrb[26].mxu1 }
 0x139   :  { %v1109_v12 = vpop.f32.mrb[27].mxu0  ;;  %v1157_v13 = vpop.f32.mrb[27].mxu1 }
 0x13a   :  { %v1110_v14 = vadd.f32 %v1109_v12, %v1108_v10  ;;  %v1158_v15 = vadd.f32 %v1157_v13, %v1156_v11 }
 0x13c   :  { %v991_v16 = vpack.c.bf16 %v1110_v14, %v1107_v8  ;;  %v1031_v17 = vpack.c.bf16 %v1158_v15, %v1155_v9 }
 0x13e   :  { %1043 = vst [vmem:[%s1400_s2 + $0x30] sm:$0xff] %v991_v16   ;;  %1051 = vst [vmem:[%s1400_s2 + $0x70] sm:$0xff] %v1031_v17   ;;  %v1111_v18 = vpop.f32.mrb[28].mxu0  ;;  %v1159_v19 = vpop.f32.mrb[28].mxu1 }
 0x13f   :  { %v1112_v20 = vpop.f32.mrb[29].mxu0  ;;  %v1160_v21 = vpop.f32.mrb[29].mxu1 }
 0x140   :  { %v1113_v22 = vadd.f32 %v1112_v20, %v1111_v18  ;;  %v1161_v23 = vadd.f32 %v1160_v21, %v1159_v19  ;;  %v1114_v24 = vpop.f32.mrb[30].mxu0  ;;  %v1162_v25 = vpop.f32.mrb[30].mxu1 }
 0x141   :  { %v1115_v26 = vpop.f32.mrb[31].mxu0  ;;  %v1163_v27 = vpop.f32.mrb[31].mxu1 }
 0x142   :  { %v1116_v28 = vadd.f32 %v1115_v26, %v1114_v24  ;;  %v1164_v29 = vadd.f32 %v1163_v27, %v1162_v25 }
 0x144   :  { %v996_v30 = vpack.c.bf16 %v1116_v28, %v1113_v22  ;;  %v1036_v31 = vpack.c.bf16 %v1164_v29, %v1161_v23 }
 0x146   :  { %1044 = vst [vmem:[%s1400_s2 + $0x38] sm:$0xff] %v996_v30   ;;  %1052 = vst [vmem:[%s1400_s2 + $0x78] sm:$0xff] %v1036_v31  }
 0x147   :  { %843 = vsyncpa [#allocation4], 1 }

</bundles_post_ra>
